<compile_context>
chip_gen: v5e
topology: v5e:2x2
jax: 0.10.0
libtpu: 0.0.40
codegen_flags: <defaults>
</compile_context>

<pallas_src>
import functools

import jax
import jax.numpy as jnp
from jax.experimental import pallas as pl
from jax.experimental.pallas import tpu as pltpu

_VMEM_LIMIT = 64 * 1024 * 1024
_N_FUSED = 128  # 18 offset + 9 mask channels, zero-padded to a lane-dense 128.


# ----------------------------------------------------------------------------
# Kernel 1: fused offset_conv (3x3, 2C->18) + weight_conv (1x1, 2C->9, sigmoid).
# Grid = (batch, H row-tiles). The padded combined image for the current batch
# element stays resident in VMEM across the row-tile axis; each step builds the
# 9 conv taps as shifted slices (in-kernel im2col) and accumulates in f32.
# Output: one (rows, 128) f32 slab; cols 0..17 = offsets, 18..26 = sigmoid mask.
# ----------------------------------------------------------------------------
def _dual_conv_kernel(xp_ref, w_ref, b_ref, out_ref, *, th, W):
    r = pl.program_id(1)
    rows, n_out = out_ref.shape
    # Fold the bias into the accumulator init.
    acc = jnp.broadcast_to(b_ref[...], (rows, n_out)).astype(jnp.float32)
    for tap in range(9):
        ky, kx = divmod(tap, 3)
        x_tap = xp_ref[pl.ds(r * th + ky, th), pl.ds(kx, W), :]   # (th, W, 2C) bf16
        x_tap = x_tap.reshape(rows, x_tap.shape[-1])              # (rows, 2C)
        acc = acc + jnp.dot(x_tap, w_ref[tap],
                            preferred_element_type=jnp.float32)
    col = jax.lax.broadcasted_iota(jnp.int32, (rows, n_out), 1)
    is_mask = (col >= 18) & (col < 27)
    out_ref[...] = jnp.where(is_mask, jax.nn.sigmoid(acc), acc)


def dual_conv(comb_pad, w_fused, b_fused, *, H, W, th):
    """comb_pad: (B, H+2, W+2, 2C) bf16; w_fused: (9, 2C, 128) bf16; b: (1,128) f32.

    Returns a (B, H*W, 128) f32 slab: [:, :, :18] offsets, [:, :, 18:27] sigmoid mask.
    """
    B, Hp, Wp, C2 = comb_pad.shape
    HW = H * W
    n_out = w_fused.shape[-1]
    kernel = functools.partial(_dual_conv_kernel, th=th, W=W)
    return pl.pallas_call(
        kernel,
        out_shape=jax.ShapeDtypeStruct((B, HW, n_out), jnp.float32),
        grid=(B, H // th),
        in_specs=[
            # Constant block index along the row-tile axis -> DMA'd once per batch.
            pl.BlockSpec((None, Hp, Wp, C2), lambda b, r: (b, 0, 0, 0)),
            pl.BlockSpec((9, C2, n_out), lambda b, r: (0, 0, 0)),
            pl.BlockSpec((1, n_out), lambda b, r: (0, 0)),
        ],
        out_specs=pl.BlockSpec((None, th * W, n_out), lambda b, r: (b, r, 0)),
        compiler_params=pltpu.CompilerParams(
            dimension_semantics=("parallel", "parallel"),
            vmem_limit_bytes=_VMEM_LIMIT),
    )(comb_pad, w_fused, b_fused)


# ----------------------------------------------------------------------------
# Kernel 2: modulated deformable conv as one K = 9*C MXU contraction per row
# tile. The modulation mask / OOB validity were already folded into the sampled
# taps by the XLA-side bilinear gather, so the kernel is a plain matmul + bias.
# ----------------------------------------------------------------------------
def _deform_kernel(s_ref, w_ref, b_ref, o_ref):
    o_ref[...] = (jnp.dot(s_ref[...], w_ref[...],
                          preferred_element_type=jnp.float32)
                  + b_ref[...]).astype(o_ref.dtype)


def _pick_row_tile(m_pad):
    for t in (1024, 512, 256):
        if m_pad % t == 0 and m_pad // t >= 4:
            return t
    if m_pad % 128 == 0 and m_pad >= 256:
        return 128
    return m_pad


def deform_matmul(sampled, w, b):
    """sampled: (M_pad, 9C) bf16 (mask pre-applied); w: (9C, C) bf16; b: (1, C) f32."""
    m_pad, k = sampled.shape
    c_out = w.shape[-1]
    tm = _pick_row_tile(m_pad)
    return pl.pallas_call(
        _deform_kernel,
        out_shape=jax.ShapeDtypeStruct((m_pad, c_out), jnp.float32),
        grid=(m_pad // tm,),
        in_specs=[
            pl.BlockSpec((tm, k), lambda i: (i, 0)),
            pl.BlockSpec((k, c_out), lambda i: (0, 0)),
            pl.BlockSpec((1, c_out), lambda i: (0, 0)),
        ],
        out_specs=pl.BlockSpec((tm, c_out), lambda i: (i, 0)),
        compiler_params=pltpu.CompilerParams(
            dimension_semantics=("parallel",),
            vmem_limit_bytes=_VMEM_LIMIT),
    )(sampled, w, b)


# ----------------------------------------------------------------------------
# JAX glue: bilinear deformable sampling. The data-dependent 4-corner gather
# stays in XLA; the OOB-validity and per-tap modulation mask are folded into
# the four bilinear corner weights (no full-size validity multiplies), and the
# output is emitted directly in bf16 with taps on the channel axis.
# TODO(synk): the gather itself is not fused into a Pallas kernel; an in-kernel
# row gather was judged too lowering-risky.
# ----------------------------------------------------------------------------
def bilinear_sample_taps(x, offsets, mask9, out_dtype=jnp.bfloat16):
    """x: (B,H,W,C); offsets: (B,H,W,9,2) as (dy,dx); mask9: (B,H,W,9).

    Returns modulated taps (B, H, W, 9, C) in out_dtype (zeros outside the image).
    """
    B, H, W, C = x.shape
    f32 = jnp.float32
    k_dy = jnp.repeat(jnp.arange(3, dtype=f32) - 1.0, 3)        # (9,) row-major taps
    k_dx = jnp.tile(jnp.arange(3, dtype=f32) - 1.0, 3)
    base_y = jnp.arange(H, dtype=f32)[None, :, None, None]
    base_x = jnp.arange(W, dtype=f32)[None, None, :, None]
    py = base_y + k_dy + offsets[..., 0].astype(f32)            # (B, H, W, 9)
    px = base_x + k_dx + offsets[..., 1].astype(f32)
    y0f = jnp.floor(py)
    x0f = jnp.floor(px)
    wy = py - y0f
    wx = px - x0f
    y0 = y0f.astype(jnp.int32)
    x0 = x0f.astype(jnp.int32)

    x_flat = x.reshape(B, H * W, C)
    bidx = jnp.arange(B)[:, None, None, None]
    mask9 = mask9.astype(f32)

    def corner(yi, xi, w):
        valid = (yi >= 0) & (yi <= H - 1) & (xi >= 0) & (xi <= W - 1)
        w = jnp.where(valid, w, 0.0) * mask9                    # fold OOB + modulation
        yc = jnp.clip(yi, 0, H - 1)
        xc = jnp.clip(xi, 0, W - 1)
        vals = x_flat[bidx, yc * W + xc, :]                     # (B, H, W, 9, C)
        return vals * w[..., None]

    out = (corner(y0, x0, (1.0 - wy) * (1.0 - wx))
           + corner(y0, x0 + 1, (1.0 - wy) * wx)
           + corner(y0 + 1, x0, wy * (1.0 - wx))
           + corner(y0 + 1, x0 + 1, wy * wx))
    return out.astype(out_dtype)


# ----------------------------------------------------------------------------
# Deterministic parameter init (mirrors module __init__ / _init_weights).
# ----------------------------------------------------------------------------
def init_params(key, C):
    k1, k2 = jax.random.split(key)

    def kaiming(k, shape):  # OIHW, fan_in, leaky_relu gain sqrt(2)
        fan_in = shape[1] * shape[2] * shape[3]
        std = (2.0 / fan_in) ** 0.5
        return std * jax.random.normal(k, shape, jnp.float32)

    return dict(
        offset_w=jnp.zeros((2 * 3 * 3, 2 * C, 3, 3), jnp.float32),  # constant 0
        offset_b=jnp.zeros((2 * 3 * 3,), jnp.float32),
        weight_w=kaiming(k1, (C, 2 * C, 1, 1)),
        weight_b=jnp.zeros((C,), jnp.float32),
        deform_w=kaiming(k2, (C, C, 3, 3)),
        deform_b=jnp.zeros((C,), jnp.float32),
    )


def _pick_h_tile(H, W):
    divs = [d for d in range(H, 0, -1) if H % d == 0]
    for require_split in (True, False):
        for th in divs:
            rows = th * W
            if rows > 256:
                continue
            if rows % 8 != 0 and th != H:
                continue
            if require_split and H // th < 2:
                continue
            return th
    return H


# ----------------------------------------------------------------------------
# Forward pass.
# ----------------------------------------------------------------------------
def dynamic_cross_attention_forward(template_nchw, search_nchw, params):
    t = jnp.transpose(template_nchw, (0, 2, 3, 1))   # NHWC
    s = jnp.transpose(search_nchw, (0, 2, 3, 1))
    B, H, W, C = s.shape
    HW = H * W
    C2 = 2 * C

    # F.interpolate(bilinear, align_corners=False) == half-pixel-center linear resize.
    aligned = jax.image.resize(t, (B, H, W, C), method="linear")
    combined = jnp.concatenate([aligned, s], axis=-1).astype(jnp.bfloat16)  # (B,H,W,2C)
    comb_pad = jnp.pad(combined, ((0, 0), (1, 1), (1, 1), (0, 0)))          # 3x3 halo

    # Fused conv weight: 3x3 offset conv (18 cols) + centre-tap-only 1x1 mask conv
    # (9 cols; only the 9 channels deform_conv2d consumes), zero-padded to 128
    # lane-dense output columns. OIHW -> (tap, in, out).
    # TODO(synk): torchvision deform_conv2d requires exactly kh*kw=9 mask channels;
    # the original module passes a C-channel sigmoid map (it would raise at runtime),
    # so only the first 9 weight_conv output channels are computed / used here.
    w_off = jnp.transpose(params["offset_w"], (2, 3, 1, 0)).reshape(9, C2, 18)
    w_attn9 = jnp.transpose(params["weight_w"][:9, :, 0, 0], (1, 0))        # (2C, 9)
    w_fused = jnp.zeros((9, C2, _N_FUSED), jnp.float32)
    w_fused = w_fused.at[:, :, :18].set(w_off)
    w_fused = w_fused.at[4, :, 18:27].set(w_attn9)        # centre tap == 1x1 conv
    b_fused = jnp.zeros((_N_FUSED,), jnp.float32)
    b_fused = b_fused.at[:18].set(params["offset_b"])
    b_fused = b_fused.at[18:27].set(params["weight_b"][:9])
    b_fused = b_fused.reshape(1, _N_FUSED)

    th = _pick_h_tile(H, W)
    slab = dual_conv(comb_pad, w_fused.astype(jnp.bfloat16), b_fused, H=H, W=W, th=th)
    # slab: (B, HW, 128) f32 -> offsets cols 0..17, sigmoid mask cols 18..26.
    # TODO(synk): offsets come from a bf16-input matmul (f32 accumulation); keep the
    # offset branch fully f32 if trained-weight sub-pixel accuracy ever matters.

    # torchvision offset layout: per tap (row-major), interleaved (dy, dx) pairs.
    offsets = slab[:, :, :18].reshape(B, H, W, 9, 2)
    mask9 = slab[:, :, 18:27].reshape(B, H, W, 9)

    # deform_conv2d(search, offsets, deform_w, deform_b, mask, padding=1, stride=1):
    # bilinear sampling (mask & OOB folded in) then one K=9C contraction.
    taps = bilinear_sample_taps(s, offsets, mask9)          # (B, H, W, 9, C) bf16
    sampled = taps.reshape(B * HW, 9 * C)
    M = B * HW
    M_pad = pl.cdiv(M, 128) * 128
    if M_pad != M:
        sampled = jnp.pad(sampled, ((0, M_pad - M), (0, 0)))

    w_def = jnp.transpose(params["deform_w"], (2, 3, 1, 0)).reshape(9 * C, C)
    b_def = params["deform_b"].reshape(1, C)

    fused = deform_matmul(sampled, w_def.astype(jnp.bfloat16), b_def)       # (M_pad, C)
    fused = fused[:M].reshape(B, H, W, C)
    return jnp.transpose(fused, (0, 3, 1, 2))                               # NCHW out


if __name__ == "__main__":
    key = jax.random.PRNGKey(0)
    kp, kt, ks = jax.random.split(key, 3)
    C = 16
    params = init_params(kp, C)
    template_feat = jax.random.normal(kt, (2, C, 8, 8), jnp.float32)    # NCHW
    search_feat = jax.random.normal(ks, (2, C, 16, 16), jnp.float32)    # NCHW

    fwd = jax.jit(dynamic_cross_attention_forward)
    out = fwd(template_feat, search_feat, params)
    out = jax.block_until_ready(out)
    assert out.shape == (2, C, 16, 16), out.shape
    assert bool(jnp.isfinite(out).all())
    print("KERNEL_OK")
</pallas_src>

<mosaic_0001>
module attributes {stable_mosaic.version = 11 : i64} {
  func.func @_dual_conv_kernel(%arg0: i32, %arg1: i32, %arg2: memref<1x18x18x32xbf16, #tpu.memory_space<vmem>>, %arg3: memref<9x32x128xbf16, #tpu.memory_space<vmem>>, %arg4: memref<1x128xf32, #tpu.memory_space<vmem>>, %arg5: memref<1x128x128xf32, #tpu.memory_space<vmem>>) attributes {dimension_semantics = [#tpu.dimension_semantics<parallel>, #tpu.dimension_semantics<parallel>], iteration_bounds = array<i64: 2, 2>, scalar_prefetch = 0 : i64, scratch_operands = 0 : i64, tpu.core_type = #tpu.core_type<tc>, window_params = [{transform_indices = @transform_0, window_bounds = array<i64: 1, 18, 18, 32>}, {pipeline_mode = #tpu.pipeline_mode<synchronous>, transform_indices = @transform_1, window_bounds = array<i64: 9, 32, 128>}, {pipeline_mode = #tpu.pipeline_mode<synchronous>, transform_indices = @transform_2, window_bounds = array<i64: 1, 128>}, {transform_indices = @transform_3, window_bounds = array<i64: 1, 128, 128>}]} {
    %c0 = arith.constant 0 : index
    %c0_0 = arith.constant 0 : index
    %0 = vector.load %arg4[%c0, %c0_0] : memref<1x128xf32, #tpu.memory_space<vmem>>, vector<1x128xf32>
    %1 = vector.shape_cast %0 : vector<1x128xf32> to vector<1x128xf32>
    %2 = vector.broadcast %1 : vector<1x128xf32> to vector<128x128xf32>
    %c8_i32 = arith.constant 8 : i32
    %3 = arith.muli %arg1, %c8_i32 : i32
    %c0_i32 = arith.constant 0 : i32
    %4 = arith.addi %3, %c0_i32 : i32
    %c0_1 = arith.constant 0 : index
    %5 = arith.index_cast %4 : i32 to index
    %c0_2 = arith.constant 0 : index
    %c0_3 = arith.constant 0 : index
    %6 = vector.load %arg2[%c0_1, %5, %c0_2, %c0_3] : memref<1x18x18x32xbf16, #tpu.memory_space<vmem>>, vector<1x8x16x32xbf16>
    %7 = vector.shape_cast %6 : vector<1x8x16x32xbf16> to vector<8x16x32xbf16>
    %8 = vector.shape_cast %7 : vector<8x16x32xbf16> to vector<128x32xbf16>
    %c0_4 = arith.constant 0 : index
    %c0_5 = arith.constant 0 : index
    %c0_6 = arith.constant 0 : index
    %9 = vector.load %arg3[%c0_4, %c0_5, %c0_6] : memref<9x32x128xbf16, #tpu.memory_space<vmem>>, vector<1x32x128xbf16>
    %10 = vector.shape_cast %9 : vector<1x32x128xbf16> to vector<32x128xbf16>
    %cst = arith.constant dense<0.000000e+00> : vector<128x128xf32>
    %11 = tpu.matmul %8, %10, %cst {dimension_numbers = #tpu.dot_dimension_numbers<[1], [0], [0], [1], [0, 0, 1, 1], [], []>} : vector<128x32xbf16>, vector<32x128xbf16>, vector<128x128xf32> -> vector<128x128xf32>
    %12 = arith.addf %2, %11 : vector<128x128xf32>
    %c8_i32_7 = arith.constant 8 : i32
    %13 = arith.muli %arg1, %c8_i32_7 : i32
    %c0_i32_8 = arith.constant 0 : i32
    %14 = arith.addi %13, %c0_i32_8 : i32
    %c0_9 = arith.constant 0 : index
    %15 = arith.index_cast %14 : i32 to index
    %c1 = arith.constant 1 : index
    %c0_10 = arith.constant 0 : index
    %16 = vector.load %arg2[%c0_9, %15, %c1, %c0_10] : memref<1x18x18x32xbf16, #tpu.memory_space<vmem>>, vector<1x8x16x32xbf16>
    %17 = vector.shape_cast %16 : vector<1x8x16x32xbf16> to vector<8x16x32xbf16>
    %18 = vector.shape_cast %17 : vector<8x16x32xbf16> to vector<128x32xbf16>
    %c1_11 = arith.constant 1 : index
    %c0_12 = arith.constant 0 : index
    %c0_13 = arith.constant 0 : index
    %19 = vector.load %arg3[%c1_11, %c0_12, %c0_13] : memref<9x32x128xbf16, #tpu.memory_space<vmem>>, vector<1x32x128xbf16>
    %20 = vector.shape_cast %19 : vector<1x32x128xbf16> to vector<32x128xbf16>
    %cst_14 = arith.constant dense<0.000000e+00> : vector<128x128xf32>
    %21 = tpu.matmul %18, %20, %cst_14 {dimension_numbers = #tpu.dot_dimension_numbers<[1], [0], [0], [1], [0, 0, 1, 1], [], []>} : vector<128x32xbf16>, vector<32x128xbf16>, vector<128x128xf32> -> vector<128x128xf32>
    %22 = arith.addf %12, %21 : vector<128x128xf32>
    %c8_i32_15 = arith.constant 8 : i32
    %23 = arith.muli %arg1, %c8_i32_15 : i32
    %c0_i32_16 = arith.constant 0 : i32
    %24 = arith.addi %23, %c0_i32_16 : i32
    %c0_17 = arith.constant 0 : index
    %25 = arith.index_cast %24 : i32 to index
    %c2 = arith.constant 2 : index
    %c0_18 = arith.constant 0 : index
    %26 = vector.load %arg2[%c0_17, %25, %c2, %c0_18] : memref<1x18x18x32xbf16, #tpu.memory_space<vmem>>, vector<1x8x16x32xbf16>
    %27 = vector.shape_cast %26 : vector<1x8x16x32xbf16> to vector<8x16x32xbf16>
    %28 = vector.shape_cast %27 : vector<8x16x32xbf16> to vector<128x32xbf16>
    %c2_19 = arith.constant 2 : index
    %c0_20 = arith.constant 0 : index
    %c0_21 = arith.constant 0 : index
    %29 = vector.load %arg3[%c2_19, %c0_20, %c0_21] : memref<9x32x128xbf16, #tpu.memory_space<vmem>>, vector<1x32x128xbf16>
    %30 = vector.shape_cast %29 : vector<1x32x128xbf16> to vector<32x128xbf16>
    %cst_22 = arith.constant dense<0.000000e+00> : vector<128x128xf32>
    %31 = tpu.matmul %28, %30, %cst_22 {dimension_numbers = #tpu.dot_dimension_numbers<[1], [0], [0], [1], [0, 0, 1, 1], [], []>} : vector<128x32xbf16>, vector<32x128xbf16>, vector<128x128xf32> -> vector<128x128xf32>
    %32 = arith.addf %22, %31 : vector<128x128xf32>
    %c8_i32_23 = arith.constant 8 : i32
    %33 = arith.muli %arg1, %c8_i32_23 : i32
    %c1_i32 = arith.constant 1 : i32
    %34 = arith.addi %33, %c1_i32 : i32
    %c0_24 = arith.constant 0 : index
    %35 = arith.index_cast %34 : i32 to index
    %c0_25 = arith.constant 0 : index
    %c0_26 = arith.constant 0 : index
    %36 = vector.load %arg2[%c0_24, %35, %c0_25, %c0_26] : memref<1x18x18x32xbf16, #tpu.memory_space<vmem>>, vector<1x8x16x32xbf16>
    %37 = vector.shape_cast %36 : vector<1x8x16x32xbf16> to vector<8x16x32xbf16>
    %38 = vector.shape_cast %37 : vector<8x16x32xbf16> to vector<128x32xbf16>
    %c3 = arith.constant 3 : index
    %c0_27 = arith.constant 0 : index
    %c0_28 = arith.constant 0 : index
    %39 = vector.load %arg3[%c3, %c0_27, %c0_28] : memref<9x32x128xbf16, #tpu.memory_space<vmem>>, vector<1x32x128xbf16>
    %40 = vector.shape_cast %39 : vector<1x32x128xbf16> to vector<32x128xbf16>
    %cst_29 = arith.constant dense<0.000000e+00> : vector<128x128xf32>
    %41 = tpu.matmul %38, %40, %cst_29 {dimension_numbers = #tpu.dot_dimension_numbers<[1], [0], [0], [1], [0, 0, 1, 1], [], []>} : vector<128x32xbf16>, vector<32x128xbf16>, vector<128x128xf32> -> vector<128x128xf32>
    %42 = arith.addf %32, %41 : vector<128x128xf32>
    %c8_i32_30 = arith.constant 8 : i32
    %43 = arith.muli %arg1, %c8_i32_30 : i32
    %c1_i32_31 = arith.constant 1 : i32
    %44 = arith.addi %43, %c1_i32_31 : i32
    %c0_32 = arith.constant 0 : index
    %45 = arith.index_cast %44 : i32 to index
    %c1_33 = arith.constant 1 : index
    %c0_34 = arith.constant 0 : index
    %46 = vector.load %arg2[%c0_32, %45, %c1_33, %c0_34] : memref<1x18x18x32xbf16, #tpu.memory_space<vmem>>, vector<1x8x16x32xbf16>
    %47 = vector.shape_cast %46 : vector<1x8x16x32xbf16> to vector<8x16x32xbf16>
    %48 = vector.shape_cast %47 : vector<8x16x32xbf16> to vector<128x32xbf16>
    %c4 = arith.constant 4 : index
    %c0_35 = arith.constant 0 : index
    %c0_36 = arith.constant 0 : index
    %49 = vector.load %arg3[%c4, %c0_35, %c0_36] : memref<9x32x128xbf16, #tpu.memory_space<vmem>>, vector<1x32x128xbf16>
    %50 = vector.shape_cast %49 : vector<1x32x128xbf16> to vector<32x128xbf16>
    %cst_37 = arith.constant dense<0.000000e+00> : vector<128x128xf32>
    %51 = tpu.matmul %48, %50, %cst_37 {dimension_numbers = #tpu.dot_dimension_numbers<[1], [0], [0], [1], [0, 0, 1, 1], [], []>} : vector<128x32xbf16>, vector<32x128xbf16>, vector<128x128xf32> -> vector<128x128xf32>
    %52 = arith.addf %42, %51 : vector<128x128xf32>
    %c8_i32_38 = arith.constant 8 : i32
    %53 = arith.muli %arg1, %c8_i32_38 : i32
    %c1_i32_39 = arith.constant 1 : i32
    %54 = arith.addi %53, %c1_i32_39 : i32
    %c0_40 = arith.constant 0 : index
    %55 = arith.index_cast %54 : i32 to index
    %c2_41 = arith.constant 2 : index
    %c0_42 = arith.constant 0 : index
    %56 = vector.load %arg2[%c0_40, %55, %c2_41, %c0_42] : memref<1x18x18x32xbf16, #tpu.memory_space<vmem>>, vector<1x8x16x32xbf16>
    %57 = vector.shape_cast %56 : vector<1x8x16x32xbf16> to vector<8x16x32xbf16>
    %58 = vector.shape_cast %57 : vector<8x16x32xbf16> to vector<128x32xbf16>
    %c5 = arith.constant 5 : index
    %c0_43 = arith.constant 0 : index
    %c0_44 = arith.constant 0 : index
    %59 = vector.load %arg3[%c5, %c0_43, %c0_44] : memref<9x32x128xbf16, #tpu.memory_space<vmem>>, vector<1x32x128xbf16>
    %60 = vector.shape_cast %59 : vector<1x32x128xbf16> to vector<32x128xbf16>
    %cst_45 = arith.constant dense<0.000000e+00> : vector<128x128xf32>
    %61 = tpu.matmul %58, %60, %cst_45 {dimension_numbers = #tpu.dot_dimension_numbers<[1], [0], [0], [1], [0, 0, 1, 1], [], []>} : vector<128x32xbf16>, vector<32x128xbf16>, vector<128x128xf32> -> vector<128x128xf32>
    %62 = arith.addf %52, %61 : vector<128x128xf32>
    %c8_i32_46 = arith.constant 8 : i32
    %63 = arith.muli %arg1, %c8_i32_46 : i32
    %c2_i32 = arith.constant 2 : i32
    %64 = arith.addi %63, %c2_i32 : i32
    %c0_47 = arith.constant 0 : index
    %65 = arith.index_cast %64 : i32 to index
    %c0_48 = arith.constant 0 : index
    %c0_49 = arith.constant 0 : index
    %66 = vector.load %arg2[%c0_47, %65, %c0_48, %c0_49] : memref<1x18x18x32xbf16, #tpu.memory_space<vmem>>, vector<1x8x16x32xbf16>
    %67 = vector.shape_cast %66 : vector<1x8x16x32xbf16> to vector<8x16x32xbf16>
    %68 = vector.shape_cast %67 : vector<8x16x32xbf16> to vector<128x32xbf16>
    %c6 = arith.constant 6 : index
    %c0_50 = arith.constant 0 : index
    %c0_51 = arith.constant 0 : index
    %69 = vector.load %arg3[%c6, %c0_50, %c0_51] : memref<9x32x128xbf16, #tpu.memory_space<vmem>>, vector<1x32x128xbf16>
    %70 = vector.shape_cast %69 : vector<1x32x128xbf16> to vector<32x128xbf16>
    %cst_52 = arith.constant dense<0.000000e+00> : vector<128x128xf32>
    %71 = tpu.matmul %68, %70, %cst_52 {dimension_numbers = #tpu.dot_dimension_numbers<[1], [0], [0], [1], [0, 0, 1, 1], [], []>} : vector<128x32xbf16>, vector<32x128xbf16>, vector<128x128xf32> -> vector<128x128xf32>
    %72 = arith.addf %62, %71 : vector<128x128xf32>
    %c8_i32_53 = arith.constant 8 : i32
    %73 = arith.muli %arg1, %c8_i32_53 : i32
    %c2_i32_54 = arith.constant 2 : i32
    %74 = arith.addi %73, %c2_i32_54 : i32
    %c0_55 = arith.constant 0 : index
    %75 = arith.index_cast %74 : i32 to index
    %c1_56 = arith.constant 1 : index
    %c0_57 = arith.constant 0 : index
    %76 = vector.load %arg2[%c0_55, %75, %c1_56, %c0_57] : memref<1x18x18x32xbf16, #tpu.memory_space<vmem>>, vector<1x8x16x32xbf16>
    %77 = vector.shape_cast %76 : vector<1x8x16x32xbf16> to vector<8x16x32xbf16>
    %78 = vector.shape_cast %77 : vector<8x16x32xbf16> to vector<128x32xbf16>
    %c7 = arith.constant 7 : index
    %c0_58 = arith.constant 0 : index
    %c0_59 = arith.constant 0 : index
    %79 = vector.load %arg3[%c7, %c0_58, %c0_59] : memref<9x32x128xbf16, #tpu.memory_space<vmem>>, vector<1x32x128xbf16>
    %80 = vector.shape_cast %79 : vector<1x32x128xbf16> to vector<32x128xbf16>
    %cst_60 = arith.constant dense<0.000000e+00> : vector<128x128xf32>
    %81 = tpu.matmul %78, %80, %cst_60 {dimension_numbers = #tpu.dot_dimension_numbers<[1], [0], [0], [1], [0, 0, 1, 1], [], []>} : vector<128x32xbf16>, vector<32x128xbf16>, vector<128x128xf32> -> vector<128x128xf32>
    %82 = arith.addf %72, %81 : vector<128x128xf32>
    %c8_i32_61 = arith.constant 8 : i32
    %83 = arith.muli %arg1, %c8_i32_61 : i32
    %c2_i32_62 = arith.constant 2 : i32
    %84 = arith.addi %83, %c2_i32_62 : i32
    %c0_63 = arith.constant 0 : index
    %85 = arith.index_cast %84 : i32 to index
    %c2_64 = arith.constant 2 : index
    %c0_65 = arith.constant 0 : index
    %86 = vector.load %arg2[%c0_63, %85, %c2_64, %c0_65] : memref<1x18x18x32xbf16, #tpu.memory_space<vmem>>, vector<1x8x16x32xbf16>
    %87 = vector.shape_cast %86 : vector<1x8x16x32xbf16> to vector<8x16x32xbf16>
    %88 = vector.shape_cast %87 : vector<8x16x32xbf16> to vector<128x32xbf16>
    %c8 = arith.constant 8 : index
    %c0_66 = arith.constant 0 : index
    %c0_67 = arith.constant 0 : index
    %89 = vector.load %arg3[%c8, %c0_66, %c0_67] : memref<9x32x128xbf16, #tpu.memory_space<vmem>>, vector<1x32x128xbf16>
    %90 = vector.shape_cast %89 : vector<1x32x128xbf16> to vector<32x128xbf16>
    %cst_68 = arith.constant dense<0.000000e+00> : vector<128x128xf32>
    %91 = tpu.matmul %88, %90, %cst_68 {dimension_numbers = #tpu.dot_dimension_numbers<[1], [0], [0], [1], [0, 0, 1, 1], [], []>} : vector<128x32xbf16>, vector<32x128xbf16>, vector<128x128xf32> -> vector<128x128xf32>
    %92 = arith.addf %82, %91 : vector<128x128xf32>
    %93 = tpu.iota {dimensions = array<i32: 1>} : vector<128x128xi32>
    %c18_i32 = arith.constant 18 : i32
    %94 = vector.broadcast %c18_i32 : i32 to vector<128x128xi32>
    %95 = arith.cmpi sge, %93, %94 : vector<128x128xi32>
    %c27_i32 = arith.constant 27 : i32
    %96 = vector.broadcast %c27_i32 : i32 to vector<128x128xi32>
    %97 = arith.cmpi slt, %93, %96 : vector<128x128xi32>
    %98 = arith.andi %95, %97 : vector<128x128xi1>
    %99 = arith.negf %92 : vector<128x128xf32>
    %100 = math.exp %99 : vector<128x128xf32>
    %cst_69 = arith.constant 1.000000e+00 : f32
    %101 = vector.broadcast %cst_69 : f32 to vector<128x128xf32>
    %102 = arith.addf %101, %100 : vector<128x128xf32>
    %103 = arith.divf %101, %102 : vector<128x128xf32>
    %104 = arith.select %98, %103, %92 : vector<128x128xi1>, vector<128x128xf32>
    %c0_70 = arith.constant 0 : index
    %c0_71 = arith.constant 0 : index
    %c0_72 = arith.constant 0 : index
    %105 = vector.load %arg5[%c0_70, %c0_71, %c0_72] : memref<1x128x128xf32, #tpu.memory_space<vmem>>, vector<1x128x128xf32>
    %106 = vector.shape_cast %105 : vector<1x128x128xf32> to vector<128x128xf32>
    %107 = vector.shape_cast %104 : vector<128x128xf32> to vector<1x128x128xf32>
    tpu.vector_store %arg5[%c0_70, %c0_71, %c0_72], %107 {strides = array<i32>} : memref<1x128x128xf32, #tpu.memory_space<vmem>>, vector<1x128x128xf32>,
    return
  }
  func.func @transform_0(%arg0: i32, %arg1: i32) -> (i32, i32, i32, i32) {
    %c0_i32 = arith.constant 0 : i32
    %c0_i32_0 = arith.constant 0 : i32
    %c0_i32_1 = arith.constant 0 : i32
    %c0_i32_2 = arith.constant 0 : i32
    return %arg0, %c0_i32, %c0_i32_0, %c0_i32_1 : i32, i32, i32, i32
  }
  func.func @transform_1(%arg0: i32, %arg1: i32) -> (i32, i32, i32) {
    %c0_i32 = arith.constant 0 : i32
    %c0_i32_0 = arith.constant 0 : i32
    %c0_i32_1 = arith.constant 0 : i32
    %c0_i32_2 = arith.constant 0 : i32
    return %c0_i32, %c0_i32_0, %c0_i32_1 : i32, i32, i32
  }
  func.func @transform_2(%arg0: i32, %arg1: i32) -> (i32, i32) {
    %c0_i32 = arith.constant 0 : i32
    %c0_i32_0 = arith.constant 0 : i32
    %c0_i32_1 = arith.constant 0 : i32
    return %c0_i32, %c0_i32_0 : i32, i32
  }
  func.func @transform_3(%arg0: i32, %arg1: i32) -> (i32, i32, i32) {
    %c0_i32 = arith.constant 0 : i32
    %c0_i32_0 = arith.constant 0 : i32
    return %arg0, %arg1, %c0_i32 : i32, i32, i32
  }
}

module attributes {stable_mosaic.version = 11 : i64} {
  func.func @_deform_kernel(%arg0: i32, %arg1: memref<128x144xbf16, #tpu.memory_space<vmem>>, %arg2: memref<144x16xbf16, #tpu.memory_space<vmem>>, %arg3: memref<1x16xf32, #tpu.memory_space<vmem>>, %arg4: memref<128x16xf32, #tpu.memory_space<vmem>>) attributes {dimension_semantics = [#tpu.dimension_semantics<parallel>], iteration_bounds = array<i64: 4>, scalar_prefetch = 0 : i64, scratch_operands = 0 : i64, tpu.core_type = #tpu.core_type<tc>, window_params = [{transform_indices = @transform_0, window_bounds = array<i64: 128, 144>}, {pipeline_mode = #tpu.pipeline_mode<synchronous>, transform_indices = @transform_1, window_bounds = array<i64: 144, 16>}, {pipeline_mode = #tpu.pipeline_mode<synchronous>, transform_indices = @transform_2, window_bounds = array<i64: 1, 16>}, {transform_indices = @transform_3, window_bounds = array<i64: 128, 16>}]} {
    %c0 = arith.constant 0 : index
    %c0_0 = arith.constant 0 : index
    %0 = vector.load %arg1[%c0, %c0_0] : memref<128x144xbf16, #tpu.memory_space<vmem>>, vector<128x144xbf16>
    %c0_1 = arith.constant 0 : index
    %c0_2 = arith.constant 0 : index
    %1 = vector.load %arg2[%c0_1, %c0_2] : memref<144x16xbf16, #tpu.memory_space<vmem>>, vector<144x16xbf16>
    %cst = arith.constant dense<0.000000e+00> : vector<128x16xf32>
    %2 = tpu.matmul %0, %1, %cst {dimension_numbers = #tpu.dot_dimension_numbers<[1], [0], [0], [1], [0, 0, 1, 1], [], []>} : vector<128x144xbf16>, vector<144x16xbf16>, vector<128x16xf32> -> vector<128x16xf32>
    %c0_3 = arith.constant 0 : index
    %c0_4 = arith.constant 0 : index
    %3 = vector.load %arg3[%c0_3, %c0_4] : memref<1x16xf32, #tpu.memory_space<vmem>>, vector<1x16xf32>
    %4 = vector.broadcast %3 : vector<1x16xf32> to vector<128x16xf32>
    %5 = arith.addf %2, %4 : vector<128x16xf32>
    %c0_5 = arith.constant 0 : index
    %c0_6 = arith.constant 0 : index
    %6 = vector.load %arg4[%c0_5, %c0_6] : memref<128x16xf32, #tpu.memory_space<vmem>>, vector<128x16xf32>
    tpu.vector_store %arg4[%c0_5, %c0_6], %5 {strides = array<i32>} : memref<128x16xf32, #tpu.memory_space<vmem>>, vector<128x16xf32>,
    return
  }
  func.func @transform_0(%arg0: i32) -> (i32, i32) {
    %c0_i32 = arith.constant 0 : i32
    %c0_i32_0 = arith.constant 0 : i32
    return %arg0, %c0_i32 : i32, i32
  }
  func.func @transform_1(%arg0: i32) -> (i32, i32) {
    %c0_i32 = arith.constant 0 : i32
    %c0_i32_0 = arith.constant 0 : i32
    %c0_i32_1 = arith.constant 0 : i32
    return %c0_i32, %c0_i32_0 : i32, i32
  }
  func.func @transform_2(%arg0: i32) -> (i32, i32) {
    %c0_i32 = arith.constant 0 : i32
    %c0_i32_0 = arith.constant 0 : i32
    %c0_i32_1 = arith.constant 0 : i32
    return %c0_i32, %c0_i32_0 : i32, i32
  }
  func.func @transform_3(%arg0: i32) -> (i32, i32) {
    %c0_i32 = arith.constant 0 : i32
    %c0_i32_0 = arith.constant 0 : i32
    return %arg0, %c0_i32 : i32, i32
  }
}

</mosaic_0001>

<bundles_post_ra>
// kernel: tile.8
= control target key start
LH: loop header
LB: loop body
LE: loop exit
PB: predicated region body
PF: predicated region fallthrough
CT: control target
= control target key end

     0   :  { %s22_s0 = inlined_call_operand.vmem [shape: f32[3], index: 0, kind: input, shape index: {}]   ;;  %s23_s1 = inlined_call_operand.vmem [shape: f32[3,3], index: 1, kind: output, shape index: {}]  }
   0x1   :  { %v4_v0 = vld [vmem:[%s22_s0] ss:$0 sm:$0xff] }
   0x2   :  { %5 = vst [vmem:[%s23_s1] sm:$0xf] %v4_v0 }

</bundles_post_ra>
